<compile_context>
chip_gen: v7x
topology: tpu7x:2x2x1
jax: 0.10.0
libtpu: 0.0.40
codegen_flags: <defaults>
</compile_context>

<pallas_src>
import jax
import jax.numpy as jnp
from jax.experimental import pallas as pl
from jax.experimental.pallas import tpu as pltpu


# ------------------------------- kernels -----------------------------------

def _add_one_scalar_kernel(x_ref, o_ref):
    # Scalar path: data lives in SMEM, add runs on the scalar ALUs.
    o_ref[0] = x_ref[0] + jnp.asarray(1, dtype=x_ref.dtype)


def _add_one_tile_kernel(x_ref, o_ref):
    # Elementwise VPU path in the native dtype (no f32 round trip).
    o_ref[...] = x_ref[...] + jnp.asarray(1, dtype=x_ref.dtype)


# ----------------------------- sizing helpers --------------------------------

_LANE = 128


def _sublane_multiple(dtype) -> int:
    # f32 -> 8, bf16 -> 16, int8/fp8 -> 32 (sub-32-bit dtypes pack sublanes).
    itemsize = jnp.dtype(dtype).itemsize
    return max(8, 32 // max(itemsize, 1))


def _vmem_capacity_bytes() -> int:
    try:
        info = pltpu.get_tpu_info()
    except Exception:
        return 64 << 20  # conservative: assume v7x-sized VMEM
    for attr in ("vmem_capacity_bytes", "vmem_size_bytes", "vmem_bytes"):
        v = getattr(info, attr, None)
        if v:
            return int(v)
    return 64 << 20


def _vmem_budgets():
    """Returns (per_block_byte_budget, vmem_limit_bytes)."""
    cap = _vmem_capacity_bytes()
    if cap <= (64 << 20):
        # v7x: 64 MiB physical per TC. (in+out) x 2 double buffers of 8 MiB
        # blocks = 32 MiB, comfortably under a raised 48 MiB scoped limit.
        return 8 << 20, 48 << 20
    # v5e / v6e: 128 MiB physical; raise the scoped limit well above the
    # 16/32 MiB defaults so multi-MiB blocks actually compile.
    return 8 << 20, 96 << 20


# ------------------------------- wrapper ------------------------------------

def _scalar_forward(got: jax.Array) -> jax.Array:
    """The spec's case (torch.tensor(1.0)): scalar add through SMEM."""
    x = got.reshape((1,))
    out = pl.pallas_call(
        _add_one_scalar_kernel,
        out_shape=jax.ShapeDtypeStruct((1,), x.dtype),
        in_specs=[pl.BlockSpec(memory_space=pltpu.SMEM)],
        out_specs=pl.BlockSpec(memory_space=pltpu.SMEM),
    )(x)
    return out.reshape(got.shape)


def _tiled_forward(got: jax.Array, donate_input: bool = False) -> jax.Array:
    """General elementwise path: lane-dense, byte-budgeted, pipelined tiles."""
    orig_shape = got.shape
    dtype = got.dtype
    itemsize = jnp.dtype(dtype).itemsize
    size = got.size
    sub = _sublane_multiple(dtype)
    block_budget, vmem_limit = _vmem_budgets()

    n = orig_shape[-1]
    m = size // n

    # Unaligned last dim: prefer reshaping (wrapper-side layout plumbing only)
    # to a lane-dense 2-D slab whenever the total size allows it.
    if n % _LANE != 0 and size % _LANE == 0:
        max_n = max(_LANE, (block_budget // (sub * itemsize) // _LANE) * _LANE)
        n = _LANE
        while size % (n * 2) == 0 and n * 2 <= max_n:
            n *= 2
        m = size // n

    x2d = got.reshape((m, n))

    if n % _LANE == 0 and n * itemsize * sub > block_budget:
        # Very wide rows: tile columns too (2-D grid), keep blocks in budget.
        tn = max(_LANE, (block_budget // (sub * itemsize) // _LANE) * _LANE)
        tm = sub
        grid = (pl.cdiv(m, tm), pl.cdiv(n, tn))
        block = (tm, tn)
        index_map = lambda i, j: (i, j)
        dim_sem = ("parallel", "parallel")
    elif n % _LANE == 0:
        # Lane-dense row tiles: tm derived purely from the byte budget,
        # rounded to the dtype's sublane-packing multiple.
        tm = max(sub, (block_budget // (n * itemsize) // sub) * sub)
        if tm >= m:
            tm = m
            if m >= 2 * sub:
                # Keep >=2 grid steps so v7x's two TensorCores both stream.
                tm = ((-(-m // 2) + sub - 1) // sub) * sub
        grid = (pl.cdiv(m, tm),)
        block = (tm, n)
        index_map = lambda i: (i, 0)
        dim_sem = ("parallel",)
    else:
        # Truly unaligned last dim: still grid over rows; the block's last dim
        # equals the full last dim (exempt from the 128 rule).
        tm = max(sub, (block_budget // max(n * itemsize, 1) // sub) * sub)
        if tm >= m:
            tm = m
        grid = (pl.cdiv(m, tm),)
        block = (tm, n)
        index_map = lambda i: (i, 0)
        dim_sem = ("parallel",)

    extra_kwargs = {}
    if donate_input:
        # Pure elementwise update with identical in/out index maps: reuse the
        # input HBM buffer (footprint saving only; HBM traffic is unchanged).
        extra_kwargs["input_output_aliases"] = {0: 0}

    out = pl.pallas_call(
        _add_one_tile_kernel,
        out_shape=jax.ShapeDtypeStruct((m, n), dtype),
        grid=grid,
        in_specs=[pl.BlockSpec(block, index_map)],
        out_specs=pl.BlockSpec(block, index_map),
        compiler_params=pltpu.CompilerParams(
            dimension_semantics=dim_sem,
            vmem_limit_bytes=vmem_limit,
        ),
        cost_estimate=pl.CostEstimate(
            flops=size,
            transcendentals=0,
            bytes_accessed=2 * size * itemsize,
        ),
        **extra_kwargs,
    )(x2d)
    return out.reshape(orig_shape)


def work_forward(got, donate_input: bool = False) -> jax.Array:
    """Pallas equivalent of Work.forward: returns got + 1 (native dtype)."""
    got = jnp.asarray(got)
    if got.size == 1:
        return _scalar_forward(got)
    return _tiled_forward(got, donate_input=donate_input)


if __name__ == "__main__":
    key = jax.random.PRNGKey(0)
    k1, k2, k3, k4 = jax.random.split(key, 4)

    # 1) The module's exact case: a 0-d float32 scalar (torch.tensor(1.0)).
    x_scalar = jnp.float32(1.0)
    out_scalar = jax.block_until_ready(work_forward(x_scalar))
    assert out_scalar.shape == x_scalar.shape
    assert out_scalar.dtype == x_scalar.dtype
    assert jnp.allclose(out_scalar, 2.0), (out_scalar,)

    # 2) Lane-dense row-tiled path (f32), >=2 grid steps.
    x_t = jax.random.normal(k1, (16, 256), dtype=jnp.float32)
    out_t = jax.block_until_ready(work_forward(x_t))
    assert out_t.shape == x_t.shape and jnp.allclose(out_t, x_t + 1.0)

    # 3) bf16 path (sublane packing multiple = 16).
    x_b = jax.random.normal(k2, (32, 384), dtype=jnp.bfloat16)
    out_b = jax.block_until_ready(work_forward(x_b))
    assert out_b.dtype == jnp.bfloat16
    assert jnp.allclose(out_b.astype(jnp.float32),
                        x_b.astype(jnp.float32) + 1.0, atol=1e-2)

    # 4) Unaligned last dim that flattens to a lane-dense slab (size % 128 == 0).
    x_f = jax.random.normal(k3, (2, 4, 16, 16), dtype=jnp.float32)
    out_f = jax.block_until_ready(work_forward(x_f))
    assert out_f.shape == x_f.shape and jnp.allclose(out_f, x_f + 1.0)

    # 5) Fully unaligned small shape (row-gridded, full-last-dim block).
    x_u = jax.random.normal(k4, (4, 5), dtype=jnp.float32)
    out_u = jax.block_until_ready(work_forward(x_u))
    assert out_u.shape == x_u.shape and jnp.allclose(out_u, x_u + 1.0)

    print("KERNEL_OK")
</pallas_src>

<mosaic_0001>
module attributes {stable_mosaic.version = 11 : i64} {
  func.func @_add_one_scalar_kernel(%arg0: memref<1xf32, #tpu.memory_space<smem>>, %arg1: memref<1xf32, #tpu.memory_space<smem>>) attributes {dimension_semantics = [], scalar_prefetch = 0 : i64, scratch_operands = 0 : i64, tpu.core_type = #tpu.core_type<tc>} {
    %c0 = arith.constant 0 : index
    %0 = memref.load %arg0[%c0] : memref<1xf32, #tpu.memory_space<smem>>
    %cst = arith.constant 1.000000e+00 : f32
    %1 = arith.addf %0, %cst : f32
    %c0_0 = arith.constant 0 : index
    %2 = memref.load %arg1[%c0_0] : memref<1xf32, #tpu.memory_space<smem>>
    memref.store %1, %arg1[%c0_0] : memref<1xf32, #tpu.memory_space<smem>>
    return
  }
}

</mosaic_0001>

<bundles_post_ra>
// kernel: tpu_custom_call.1
= control target key start
LH: loop header
LB: loop body
LE: loop exit
PB: predicated region body
PF: predicated region fallthrough
CT: control target
= control target key end

     0   :  { %7 = vsyncpa [#allocation4], 0  ;;  %s66_s0 = inlined_call_operand.<no memory space> [shape: f32[1], index: 0, kind: input, shape index: {}]   ;;  %s67_s1 = inlined_call_operand.hbm [shape: f32[1], index: 1, kind: output, shape index: {}]  }
   0x1   :  { %s11_s8 = sadd.f32 1.0, %s66_s0  ;;  %s28_s11 = scalar_lea.hbm %s67_s1, 16 }
   0x2   :  { %p29_p0 = scmp.ne.s32.totalorder %s67_s1, %s28_s11  ;;  %p32_p1 = scmp.lt.u32.totalorder %s28_s11, %s67_s1 }
   0x3   :  { %13 = sst [smem:[#allocation3]] %s11_s8 }
   0x4   :  { %p34_p2 = pnand %p32_p1, %p29_p0 }
   0x6   :  { %37 = shalt.err (!%p34_p2)
}
   0x7   :  { %s40_s16 = smov [#allocation3]  }
   0x8   :  { %21 = dma.smem_to_hbm %s40_s16, 16, %s67_s1, [#allocation4]  }
   0x9   :  { %38 = dma.done.wait [#allocation4], 16  }
   0xa   :  { %39 = vsyncadd [#allocation4], 4294967280 }
   0xb   :  { %25 = sfence }
   0xc   :  { %26 = vsyncpa [#allocation4], 1 }

</bundles_post_ra>
